<compile_context>
chip_gen: v7x
topology: tpu7x:2x2x1
jax: 0.10.0
libtpu: 0.0.40
codegen_flags: <defaults>
</compile_context>

<pallas_src>
import functools

import jax
import jax.numpy as jnp
from jax.experimental import pallas as pl
from jax.experimental.pallas import tpu as pltpu


def _round_up(x, m):
    return (x + m - 1) // m * m


_LANE = 128
_MAX_W_TILE = 1024        # full-W tiles up to this; larger graphs use 512-tiles
_LARGE_W_TILE = 512
_MAX_F_TILE = 2048        # cap on the lane-axis (F) tile
_VMEM_BUDGET = 32 * 1024 * 1024   # per-step working-set budget (fits v5e/v6e/v7x)
_VMEM_LIMIT = 64 * 1024 * 1024    # explicit scoped-VMEM limit for the compiler


def _gconv_kernel(a_ref, x_ref, o_ref, acc_ref):
    """One (tw, tk) @ (tk, tf) MXU tile of out[b] = A[b] @ x[b].

    a_ref:   (tw, tk)  adjacency tile (batch dim squeezed when per-batch A)
    x_ref:   (tk, tf)  flattened-feature tile of x[b]
    o_ref:   (tw, tf)  output tile
    acc_ref: (tw, tf)  f32 accumulator, resident across the k (reduction) axis
    """
    k = pl.program_id(3)

    @pl.when(k == 0)
    def _():
        acc_ref[...] = jnp.zeros_like(acc_ref)

    acc_ref[...] += jnp.dot(a_ref[...], x_ref[...],
                            preferred_element_type=jnp.float32)

    @pl.when(k == pl.num_programs(3) - 1)
    def _():
        o_ref[...] = acc_ref[...].astype(o_ref.dtype)


@functools.partial(jax.jit, static_argnames=("graph_shape",))
def gconv(A, x, graph_shape=2):
    """Pallas implementation of gconv.forward.

    A: (N, N) if graph_shape == 2, else (B, N, N)
    x: (B, W, T, C) with W == N
    returns: (B, N, T, C)
    """
    if graph_shape not in (2, 3):
        raise ValueError(f"graph_shape must be 2 or 3, got {graph_shape}")

    B, W, T, C = x.shape
    if graph_shape == 2:
        if A.shape != (W, W):
            raise ValueError(f"A must be (W, W)=({W},{W}), got {A.shape}")
    else:
        if A.shape != (B, W, W):
            raise ValueError(f"A must be (B, W, W)=({B},{W},{W}), got {A.shape}")

    dtype = jnp.result_type(A.dtype, x.dtype)
    A = A.astype(dtype)
    x = x.astype(dtype)
    itemsize = jnp.dtype(dtype).itemsize
    sub = max(8, (8 * 4) // itemsize)     # sublane multiple: 8 f32, 16 bf16, 32 int8

    F = T * C
    x_flat = x.reshape(B, W, F)

    # ---- W (node) tiling -------------------------------------------------
    if W <= _MAX_W_TILE:
        tw = tk = _round_up(W, sub)
        W_pad = tw
    else:
        tw = tk = _LARGE_W_TILE
        W_pad = _round_up(W, _LARGE_W_TILE)

    # ---- F (feature) tiling, sized against the VMEM budget ---------------
    # per-F-column bytes: x (2 bufs) + out (2 bufs) + f32 accumulator
    per_col = 2 * tk * itemsize + 2 * tw * itemsize + 4 * tw
    fixed = 2 * tw * tk * itemsize                     # A, double-buffered
    avail = max(_VMEM_BUDGET - fixed, per_col * _LANE)
    tf = max(_LANE, min(_MAX_F_TILE, (avail // per_col) // _LANE * _LANE))
    F_pad128 = _round_up(F, _LANE)
    if F_pad128 <= tf:
        tf = F_pad128
        F_pad = F_pad128
    else:
        F_pad = _round_up(F, tf)

    # ---- zero-pad to tile boundaries (zeros add nothing to the matmul) ---
    if (W_pad, F_pad) != (W, F):
        x_flat = jnp.pad(x_flat, ((0, 0), (0, W_pad - W), (0, F_pad - F)))
    if W_pad != W:
        if graph_shape == 2:
            A = jnp.pad(A, ((0, W_pad - W), (0, W_pad - W)))
        else:
            A = jnp.pad(A, ((0, 0), (0, W_pad - W), (0, W_pad - W)))

    n_i = W_pad // tw
    n_f = F_pad // tf
    n_k = W_pad // tk
    grid = (B, n_i, n_f, n_k)

    if graph_shape == 2:
        # Shared adjacency: index_map ignores b and f, so the tile stays resident.
        a_spec = pl.BlockSpec((tw, tk), lambda b, i, f, k: (i, k))
        a_bytes = W_pad * W_pad * itemsize
    else:
        # Per-batch adjacency: squeeze the leading batch dim from the kernel view.
        a_spec = pl.BlockSpec((pl.Squeezed(), tw, tk), lambda b, i, f, k: (b, i, k))
        a_bytes = B * W_pad * W_pad * itemsize

    x_spec = pl.BlockSpec((pl.Squeezed(), tk, tf), lambda b, i, f, k: (b, k, f))
    o_spec = pl.BlockSpec((pl.Squeezed(), tw, tf), lambda b, i, f, k: (b, i, f))

    cost = pl.CostEstimate(
        flops=2 * B * W_pad * W_pad * F_pad,
        transcendentals=0,
        bytes_accessed=a_bytes + 2 * B * W_pad * F_pad * itemsize,
    )

    out_flat = pl.pallas_call(
        _gconv_kernel,
        out_shape=jax.ShapeDtypeStruct((B, W_pad, F_pad), dtype),
        grid_spec=pltpu.PrefetchScalarGridSpec(
            num_scalar_prefetch=0,
            grid=grid,
            in_specs=[a_spec, x_spec],
            out_specs=o_spec,
            scratch_shapes=[pltpu.VMEM((tw, tf), jnp.float32)],
        ),
        compiler_params=pltpu.CompilerParams(
            dimension_semantics=("parallel", "parallel", "parallel", "arbitrary"),
            vmem_limit_bytes=_VMEM_LIMIT,
        ),
        cost_estimate=cost,
    )(A, x_flat)

    # Strip padding and restore the (B, H, T, C) layout.  (.contiguous() is a no-op.)
    return out_flat[:, :W, :F].reshape(B, W, T, C)


def _reference(A, x, graph_shape=2):
    if graph_shape == 2:
        return jnp.einsum("hw,bwtc->bhtc", A, x)
    return jnp.einsum("bhw,bwtc->bhtc", A, x)


if __name__ == "__main__":
    key = jax.random.PRNGKey(0)
    k_a, k_x, k_ab, k_x2, k_a2 = jax.random.split(key, 5)

    B, N, T, C = 2, 4, 8, 32
    x = jax.random.normal(k_x, (B, N, T, C), dtype=jnp.float32)

    # graph_shape == 2: shared adjacency (N, N)
    A = jax.random.normal(k_a, (N, N), dtype=jnp.float32)
    out2 = gconv(A, x, graph_shape=2)
    jax.block_until_ready(out2)
    ref2 = _reference(A, x, graph_shape=2)
    assert out2.shape == (B, N, T, C)
    assert jnp.allclose(out2, ref2, atol=1e-5, rtol=1e-5)

    # graph_shape == 3: per-batch adjacency (B, N, N)
    Ab = jax.random.normal(k_ab, (B, N, N), dtype=jnp.float32)
    out3 = gconv(Ab, x, graph_shape=3)
    jax.block_until_ready(out3)
    ref3 = _reference(Ab, x, graph_shape=3)
    assert out3.shape == (B, N, T, C)
    assert jnp.allclose(out3, ref3, atol=1e-5, rtol=1e-5)

    # Unaligned shapes exercise the padding path (W=6 -> 8, F=60 -> 128).
    B2, N2, T2, C2 = 2, 6, 5, 12
    x2 = jax.random.normal(k_x2, (B2, N2, T2, C2), dtype=jnp.float32)
    A2 = jax.random.normal(k_a2, (N2, N2), dtype=jnp.float32)
    out4 = gconv(A2, x2, graph_shape=2)
    jax.block_until_ready(out4)
    ref4 = _reference(A2, x2, graph_shape=2)
    assert out4.shape == (B2, N2, T2, C2)
    assert jnp.allclose(out4, ref4, atol=1e-5, rtol=1e-5)

    print("KERNEL_OK")
</pallas_src>

<mosaic_0001>
module attributes {stable_mosaic.version = 11 : i64} {
  func.func @_gconv_kernel(%arg0: i32, %arg1: i32, %arg2: i32, %arg3: i32, %arg4: memref<8x8xf32, #tpu.memory_space<vmem>>, %arg5: memref<1x8x256xf32, #tpu.memory_space<vmem>>, %arg6: memref<1x8x256xf32, #tpu.memory_space<vmem>>, %arg7: memref<8x256xf32, #tpu.memory_space<vmem>>) attributes {dimension_semantics = [#tpu.dimension_semantics<parallel>, #tpu.dimension_semantics<parallel>, #tpu.dimension_semantics<parallel>, #tpu.dimension_semantics<arbitrary>], iteration_bounds = array<i64: 2, 1, 1, 1>, scalar_prefetch = 0 : i64, scratch_operands = 1 : i64, tpu.core_type = #tpu.core_type<tc>, window_params = [{transform_indices = @transform_0, window_bounds = array<i64: 8, 8>}, {transform_indices = @transform_1, window_bounds = array<i64: 1, 8, 256>}, {transform_indices = @transform_2, window_bounds = array<i64: 1, 8, 256>}]} {
    %c0_i32 = arith.constant 0 : i32
    %0 = arith.cmpi eq, %arg3, %c0_i32 : i32
    %1 = arith.extui %0 : i1 to i32
    %c0_i32_0 = arith.constant 0 : i32
    %2 = arith.cmpi ne, %1, %c0_i32_0 : i32
    scf.if %2 {
      %cst_11 = arith.constant 0.000000e+00 : f32
      %13 = vector.broadcast %cst_11 : f32 to vector<8x256xf32>
      %c0_12 = arith.constant 0 : index
      %c0_13 = arith.constant 0 : index
      %14 = vector.load %arg7[%c0_12, %c0_13] : memref<8x256xf32, #tpu.memory_space<vmem>>, vector<8x256xf32>
      tpu.vector_store %arg7[%c0_12, %c0_13], %13 {strides = array<i32>} : memref<8x256xf32, #tpu.memory_space<vmem>>, vector<8x256xf32>,
    } else {
    }
    %c0 = arith.constant 0 : index
    %c0_1 = arith.constant 0 : index
    %3 = vector.load %arg7[%c0, %c0_1] : memref<8x256xf32, #tpu.memory_space<vmem>>, vector<8x256xf32>
    %c0_2 = arith.constant 0 : index
    %c0_3 = arith.constant 0 : index
    %4 = vector.load %arg4[%c0_2, %c0_3] : memref<8x8xf32, #tpu.memory_space<vmem>>, vector<8x8xf32>
    %c0_4 = arith.constant 0 : index
    %c0_5 = arith.constant 0 : index
    %c0_6 = arith.constant 0 : index
    %5 = vector.load %arg5[%c0_4, %c0_5, %c0_6] : memref<1x8x256xf32, #tpu.memory_space<vmem>>, vector<1x8x256xf32>
    %6 = vector.shape_cast %5 : vector<1x8x256xf32> to vector<8x256xf32>
    %cst = arith.constant dense<0.000000e+00> : vector<8x256xf32>
    %7 = tpu.matmul %4, %6, %cst {dimension_numbers = #tpu.dot_dimension_numbers<[1], [0], [0], [1], [0, 0, 1, 1], [], []>} : vector<8x8xf32>, vector<8x256xf32>, vector<8x256xf32> -> vector<8x256xf32>
    %8 = arith.addf %3, %7 : vector<8x256xf32>
    %c0_7 = arith.constant 0 : index
    %c0_8 = arith.constant 0 : index
    %9 = vector.load %arg7[%c0_7, %c0_8] : memref<8x256xf32, #tpu.memory_space<vmem>>, vector<8x256xf32>
    tpu.vector_store %arg7[%c0_7, %c0_8], %8 {strides = array<i32>} : memref<8x256xf32, #tpu.memory_space<vmem>>, vector<8x256xf32>,
    %c0_i32_9 = arith.constant 0 : i32
    %10 = arith.cmpi eq, %arg3, %c0_i32_9 : i32
    %11 = arith.extui %10 : i1 to i32
    %c0_i32_10 = arith.constant 0 : i32
    %12 = arith.cmpi ne, %11, %c0_i32_10 : i32
    scf.if %12 {
      %c0_11 = arith.constant 0 : index
      %c0_12 = arith.constant 0 : index
      %13 = vector.load %arg7[%c0_11, %c0_12] : memref<8x256xf32, #tpu.memory_space<vmem>>, vector<8x256xf32>
      %c0_13 = arith.constant 0 : index
      %c0_14 = arith.constant 0 : index
      %c0_15 = arith.constant 0 : index
      %14 = vector.load %arg6[%c0_13, %c0_14, %c0_15] : memref<1x8x256xf32, #tpu.memory_space<vmem>>, vector<1x8x256xf32>
      %15 = vector.shape_cast %14 : vector<1x8x256xf32> to vector<8x256xf32>
      %16 = vector.shape_cast %13 : vector<8x256xf32> to vector<1x8x256xf32>
      tpu.vector_store %arg6[%c0_13, %c0_14, %c0_15], %16 {strides = array<i32>} : memref<1x8x256xf32, #tpu.memory_space<vmem>>, vector<1x8x256xf32>,
    } else {
    }
    return
  }
  func.func @transform_0(%arg0: i32, %arg1: i32, %arg2: i32, %arg3: i32) -> (i32, i32) {
    %c0_i32 = arith.constant 0 : i32
    return %arg1, %arg3 : i32, i32
  }
  func.func @transform_1(%arg0: i32, %arg1: i32, %arg2: i32, %arg3: i32) -> (i32, i32, i32) {
    %c0_i32 = arith.constant 0 : i32
    return %arg0, %arg3, %arg2 : i32, i32, i32
  }
  func.func @transform_2(%arg0: i32, %arg1: i32, %arg2: i32, %arg3: i32) -> (i32, i32, i32) {
    %c0_i32 = arith.constant 0 : i32
    return %arg0, %arg1, %arg2 : i32, i32, i32
  }
}

</mosaic_0001>

<bundles_post_ra>
// kernel: gconv.1
= control target key start
LH: loop header
LB: loop body
LE: loop exit
PB: predicated region body
PF: predicated region fallthrough
CT: control target
= control target key end

     0   :  { %7 = vsyncpa [#allocation4], 0  ;;  %s923_s0 = inlined_call_operand.hbm [shape: f32[8,8], index: 0, kind: input, shape index: {}]   ;;  %s924_s1 = inlined_call_operand.hbm [shape: f32[2,8,256], index: 1, kind: input, shape index: {}]   ;;  %s925_s2 = inlined_call_operand.hbm [shape: f32[2,8,256], index: 2, kind: output, shape index: {}]  }
   0x1   :  { %8 = vsyncpa [#allocation7], 0 }
   0x2   :  { %10 = vsyncpa [#allocation7 + $0x1], 0 }
   0x3   :  { %11 = vsyncpa [#allocation5], 0 }
   0x4   :  { %13 = vsyncpa [#allocation5 + $0x1], 0  ;;  %s707_s9 = smov 0   ;;  %s709_s10 = smov 0  }
   0x5   :  { %s711_s11 = smov 0   ;;  %s713_s12 = smov 0  }
   0x6   :  { %s715_s13 = smov 0   ;;  %s717_s14 = smov 0  }
   0x7 LB: > { %s448_s15 = sadd.s32 4294967295, %s686_s14   ;;  %s449_s16 = sadd.s32 4294967294, %s686_s14   ;;  %s686_s14 = sphi %s717_s14, %s19_s14   ;;  %s682_s13 = sphi %s715_s13, %s950_s13   ;;  %s678_s12 = sphi %s713_s12, %s949_s12   ;;  %s674_s11 = sphi %s711_s11, %s948_s11   ;;  %s670_s10 = sphi %s709_s10, %s947_s10   ;;  %s666_s9 = sphi %s707_s9, %s946_s9  }
   0x8   : > { %p97_p0 = scmp.ne.s32.totalorder %s670_s10, %s666_s9  ;;  %p741_p1 = scmp.eq.s32.totalorder %s448_s15, 0 }
   0x9   : > { %p745_p2 = scmp.eq.s32.totalorder %s448_s15, 1  ;;  %p131_p3 = scmp.eq.s32.totalorder %s449_s16, 1 }
   0xa   : > { %s930_s17 = scalar_select %p741_p1, 1, 0 }
   0xb   : > { %s931_s18 = scalar_select %p745_p2, 1, 0 }
   0xc   : > { %p751_p4 = por %p741_p1, %p97_p0  ;;  %p450_p5 = scmp.ge.s32.totalorder %s686_s14, 1 }
   0xd   : > { %p756_p6 = por %p131_p3, %p97_p0  ;;  %p138_p7 = scmp.lt.s32.totalorder %s686_s14, 3 }
   0xe   : > { %s932_s19 = scalar_select %p751_p4, 1, 0 }
   0xf   : > { %s933_s20 = scalar_select %p756_p6, 1, 0 }
  0x10   : > { %p761_p8 = pnand %p450_p5, %p138_p7  ;;  %s688_s22 = smov [#allocation3]  }
  0x11   : > { %s154_s23 = sshll.u32 %s688_s22, 4  ;;  %s45_s25 = sadd.s32 1, %s682_s13  ;;  %s155_s23 = int_to_ptr.vmem [resolvable:$true] %s154_s23 }
  0x12   : > { %s934_s21 = scalar_select %p761_p8, 1, 0 }
  0x13   : > { %p476_p10 = pneg %p761_p8  ;;  %s84_s26 = sadd.s32 1, %s674_s11 }
  0x14   : > { %p776_p12 = scmp.ge.s32.totalorder %s45_s25, 2  ;;  %s542_s30 = scalar_lea.hbm %s923_s0, 128 }
  0x15   : > { %p770_p11 = pnand %p476_p10, %p741_p1  ;;  %p543_p13 = scmp.ne.s32.totalorder %s923_s0, %s542_s30 }
  0x16   : > { %s936_s27 = scalar_select %p776_p12, 1, 0 }
  0x17   : > { %p544_p0 = pneg %p770_p11  ;;  %p549_p7 = scmp.lt.u32.totalorder %s542_s30, %s923_s0 }
  0x19   : > { %p545_p3 = pnand %p544_p0, %p543_p13 }
  0x1b   : > { %p546_p5 = pneg %p545_p3 }
  0x1d   : > { %p551_p10 = pnand %p549_p7, %p546_p5 }
  0x1f   : > { %554 = shalt.err (!%p551_p10)
}
  0x20   : > { %s555_s7 = scalar_lea.vmem %s155_s23, 128  ;;  %p563_p1 = scmp.lt.s32.totalorder %s155_s23, %s155_s23 }
  0x21   : > { %p556_p9 = scmp.ne.s32.totalorder %s155_s23, %s555_s7  ;;  %p564_p8 = scmp.lt.s32.totalorder %s555_s7, %s555_s7 }
  0x23   : > { %p558_p6 = pnand %p556_p9, %p544_p0  ;;  %p565_p2 = por %p564_p8, %p563_p1 }
  0x25   : > { %p559_p4 = pneg %p558_p6 }
  0x27   : > { %p566_p12 = pnand %p565_p2, %p559_p4 }
  0x29   : > { %569 = shalt.err (!%p566_p12)
}
  0x2a   : > { %479 = dma.hbm_to_vmem [thread:$0]  (!%p770_p11), %s923_s0, 128, %s155_s23, [#allocation4]  }
  0x2b   : > { %p937_p1 = scmp.ne.s32.totalorder %s936_s27, 0  ;;  %p91_p2 = scmp.ne.s32.totalorder %s674_s11, %s670_s10 }
  0x2c   : > { %p92_p4 = scmp.eq.s32.totalorder %s686_s14, 0  ;;  %p489_p6 = scmp.lt.s32.totalorder %s686_s14, 2 }
  0x2d   : > { %s952_s25 = smov (%p937_p1, %s45_s25), 0  ;;  %p938_p12 = scmp.ne.s32.totalorder %s931_s18, 0 }
  0x2e   : > { %s77_s16 = ssub.s32 %s682_s13, %s952_s25  ;;  %p93_p9 = por %p92_p4, %p91_p2 }
  0x2f   : > { %p82_p8 = scmp.eq.s32.totalorder %s77_s16, 0  ;;  %p808_p13 = por %p938_p12, %p91_p2 }
  0x30   : > { %s165_s24 = sand.u32 1, %s674_s11   ;;  %s466_s27 = sshll.u32 %s682_s13, 8 }
  0x31   : > { %s816_s28 = scalar_select %p82_p8, %s674_s11, %s84_s26  }
  0x32   : > { %s453_s23 = sshll.u32 %s165_s24, 4  ;;  %s822_s3 = scalar_lea.hbm %s924_s1, %s466_s27 }
  0x33   : > { %s169_s18 = scalar_lea.vmem [#allocation6], %s453_s23  ;;  %p826_p11 = pnand %p489_p6, %p93_p9 }
  0x34   : > { %s181_s4 = sshll.u32 %s169_s18, 4  ;;  %s166_s26 = scalar_lea.sflag [#allocation7], %s165_s24  ;;  %s824_s4 = int_to_ptr.vmem [resolvable:$true] %s181_s4 }
  0x35   : > { %s570_s6 = scalar_lea.hbm %s822_s3, 256  ;;  %p572_p3 = pneg %p826_p11 }
  0x36   : > { %p571_p0 = scmp.ne.s32.totalorder %s822_s3, %s570_s6  ;;  %s575_s15 = scalar_lea.hbm %s924_s1, 512 }
  0x37   : > { %p576_p10 = scmp.lt.u32.totalorder %s822_s3, %s924_s1  ;;  %p577_p1 = scmp.lt.u32.totalorder %s575_s15, %s570_s6 }
  0x38   : > { %p573_p5 = pnand %p572_p3, %p571_p0  ;;  %p579_p4 = scmp.lt.u32.totalorder %s570_s6, %s822_s3 }
  0x39   : > { %p578_p2 = por %p577_p1, %p576_p10 }
  0x3a   : > { %p574_p7 = pneg %p573_p5 }
  0x3b   : > { %p580_p6 = por %p579_p4, %p578_p2 }
  0x3d   : > { %p581_p8 = pnand %p580_p6, %p574_p7 }
  0x3f   : > { %584 = shalt.err (!%p581_p8)
}
  0x40   : > { %s585_s24 = scalar_lea.vmem %s824_s4, 256  ;;  %s689_s27 = smov [#allocation6]  }
  0x41   : > { %p586_p9 = scmp.ne.s32.totalorder %s824_s4, %s585_s24  ;;  %s590_s29 = sshll.u32 %s689_s27, 4  ;;  %s591_s29 = int_to_ptr.vmem [resolvable:$false] %s590_s29 }
  0x42   : > { %s592_s30 = scalar_lea.vmem %s591_s29, 512  ;;  %p593_p5 = scmp.lt.s32.totalorder %s824_s4, %s591_s29 }
  0x43   : > { %p588_p12 = pnand %p586_p9, %p572_p3  ;;  %p594_p10 = scmp.lt.s32.totalorder %s592_s30, %s585_s24 }
  0x45   : > { %p589_p0 = pneg %p588_p12  ;;  %p595_p1 = por %p594_p10, %p593_p5 }
  0x47   : > { %p596_p2 = pnand %p595_p1, %p589_p0 }
  0x49   : > { %599 = shalt.err (!%p596_p2)
}
  0x4a   : > { %483 = dma.hbm_to_vmem [thread:$0]  (!%p826_p11), %s822_s3, 256, %s824_s4, %s166_s26  }
  0x4b   : > { %p941_p7 = scmp.ne.s32.totalorder %s934_s21, 0 }
  0x4c   : > { %p942_p3 = scmp.ne.s32.totalorder (!%p941_p7), %s930_s17, 0 }
  0x4d   : > { %190 = sbr.rel (%p941_p7) target bundleno = 319 (0x13f), region = 28 }
  0x54   : > { %653 = dma.done.wait (%p942_p3), [#allocation4], 128  }
  0x55   : > { %655 = vsyncadd (%p942_p3), [#allocation4], 4294967168  ;;  %s862_s18 = sand.u32 1, %s670_s10   ;;  %p943_p4 = scmp.ne.s32.totalorder %s932_s19, 0 }
  0x56   : > { %s458_s6 = sshll.u32 %s862_s18, 4  ;;  %s197_s5 = scalar_lea.sflag [#allocation7], %s862_s18 }
  0x57   : > { %s200_s7 = scalar_lea.vmem [#allocation6], %s458_s6 }
  0x58   : > { %657 = dma.done.wait (%p943_p4), %s197_s5, 256  }
  0x59   : > { %659 = vsyncadd (%p943_p4), %s197_s5, 4294967040  ;;  %v690_v0 = vmov 0.0   ;;  %v233_v1 = vld [vmem:[%s200_s7 + $0x8] sm:$0xff]  ;;  %v232_v2 = vld [vmem:[%s200_s7] sm:$0xff]  ;;  %vm234_vm0 = vcmask 64512   ;;  %s220_s17 = scalar_lea.vmem [#allocation8], %s458_s6 }
  0x5a   : > { %302 = vmatprep.mubr.f32.mxu0 %v690_v0  ;;  %v231_v3 = vld [vmem:[#allocation3] sm:$0xff]  ;;  %238 = vmatprep.subr.mxu0 %v233_v1  ;;  %s339_s21 = sshll.u32 %s220_s17, 4  ;;  %s467_s3 = sshll.u32 %s678_s12, 8  ;;  %s871_s21 = int_to_ptr.vmem [resolvable:$true] %s339_s21 }
  0x5b   : > { %239 = vmatpush1.msra.mxu0 %v232_v2  ;;  %s876_s26 = scalar_lea.hbm %s925_s2, %s467_s3  ;;  %s321_s8 = scalar_lea.sflag [#allocation5], %s862_s18 }
  0x5c   : > { %460 = vmatmul.mubr.msk.f32.vlgmr.msra.gmra.mrb[0].mxu0 %vm234_vm0, %v231_v3  ;;  %s600_s15 = scalar_lea.vmem %s871_s21, 256  ;;  %s691_s12 = smov [#allocation8]  }
  0x5d   : > { %p601_p11 = scmp.ne.s32.totalorder %s871_s21, %s600_s15  ;;  %s604_s16 = sshll.u32 %s691_s12, 4  ;;  %s605_s16 = int_to_ptr.vmem [resolvable:$false] %s604_s16 }
  0x5e   : > { %s606_s23 = scalar_lea.vmem %s605_s16, 512  ;;  %p607_p9 = scmp.lt.s32.totalorder %s871_s21, %s605_s16 }
  0x5f   : > { %p602_p6 = pnand %p601_p11, %p808_p13  ;;  %p608_p12 = scmp.lt.s32.totalorder %s606_s23, %s600_s15 }
  0x61   : > { %p603_p8 = pneg %p602_p6  ;;  %p609_p0 = por %p608_p12, %p607_p9 }
  0x63   : > { %p610_p5 = pnand %p609_p0, %p603_p8 }
 0x12f   : > { %v304_v4 = vpop.f32.mrb[0].mxu0 }
 0x130   : > { %318 = vst [vmem:[%s220_s17] sm:$0xff] %v304_v4  ;;  %v306_v5 = vpop.f32.mrb[1].mxu0 }
 0x131   : > { %319 = vst [vmem:[%s220_s17 + $0x8] sm:$0xff] %v306_v5 }
 0x132   : > { %613 = shalt.err (!%p610_p5)
}
 0x133   : > { %s614_s24 = scalar_lea.hbm %s876_s26, 256  ;;  %s618_s30 = scalar_lea.hbm %s925_s2, 512 }
 0x134   : > { %p615_p10 = scmp.ne.s32.totalorder %s876_s26, %s614_s24  ;;  %p619_p7 = scmp.lt.u32.totalorder %s876_s26, %s925_s2 }
 0x135   : > { %p620_p3 = scmp.lt.u32.totalorder %s618_s30, %s614_s24  ;;  %p622_p11 = scmp.lt.u32.totalorder %s614_s24, %s876_s26 }
 0x136   : > { %p616_p1 = pnand %p615_p10, %p808_p13 }
 0x137   : > { %p621_p4 = por %p620_p3, %p619_p7 }
 0x138   : > { %p617_p2 = pneg %p616_p1 }
 0x139   : > { %p623_p6 = por %p622_p11, %p621_p4 }
 0x13b   : > { %p624_p8 = pnand %p623_p6, %p617_p2 }
 0x13d   : > { %627 = shalt.err (!%p624_p8)
}
 0x13e   : > { %474 = dma.vmem_to_hbm [thread:$0]  (%p808_p13), %s871_s21, 256, %s876_s26, %s321_s8  }
 0x13f PF: > { %s351_s5 = sand.u32 1, %s666_s9   ;;  %p944_p9 = scmp.ne.s32.totalorder %s933_s20, 0 }
 0x140   : > { %p945_p12 = scmp.ge.s32.totalorder %s686_s14, 2  ;;  %s352_s7 = scalar_lea.sflag [#allocation5], %s351_s5 }
 0x142   : > { %p485_p0 = pnand %p945_p12, %p944_p9 }
 0x144   : > { %661 = dma.done.wait (!%p485_p0), %s352_s7, 256  }
 0x145   : > { %663 = vsyncadd (!%p485_p0), %s352_s7, 4294967040  ;;  %s19_s14 = sadd.s32 1, %s686_s14   ;;  %s946_s9 = smov %s670_s10 }
 0x146   : > { %p16_p5 = scmp.ge.s32.totalorder %s19_s14, 4   ;;  %s947_s10 = smov %s674_s11 }
 0x147   : > { %s948_s11 = smov %s816_s28  ;;  %s949_s12 = smov %s682_s13 }
 0x148   : > { %s950_s13 = smov %s952_s25  ;;  %18 = sbr.rel (!%p16_p5) target bundleno = 7 (0x7), region = 87 }
 0x14f   :  { %357 = vsyncpa [#allocation4], 1 }
 0x150   :  { %359 = vsyncpa [#allocation4 + $0x1], 1 }
 0x151   :  { %360 = vsyncpa [#allocation7], 1 }
 0x152   :  { %362 = vsyncpa [#allocation7 + $0x1], 1 }
 0x153   :  { %363 = vsyncpa [#allocation5], 1 }
 0x154   :  { %365 = vsyncpa [#allocation5 + $0x1], 1 }

</bundles_post_ra>
